<compile_context>
chip_gen: v6e
topology: v6e:2x2x1
jax: 0.10.0
libtpu: 0.0.40
codegen_flags: <defaults>
</compile_context>

<pallas_src>
import functools

import jax
import jax.numpy as jnp
from jax.experimental import pallas as pl
from jax.experimental.pallas import tpu as pltpu

KSIZE = 7          # Conv1d kernel_size=7
EPS = 1e-5         # nn.BatchNorm1d default eps


def _round_up(x, m):
    return ((x + m - 1) // m) * m


def _conv_stats_kernel(x_lo_ref, x_hi_ref, w_ref, conv_ref, stats_ref, *,
                       dilation: int, t_tile: int, t_valid: int):
    """Dilated conv (one fused matmul) + per-tile BN partial statistics.

    x_lo_ref  : (1, C_in, T_tile)   padded-input block t
    x_hi_ref  : (1, C_in, T_tile)   padded-input block t+1 (halo)
    w_ref     : (C_out, K*C_in)     flattened weights
    conv_ref  : (1, C_out, T_tile)  f32 conv output
    stats_ref : (1, 1, C_out, 2)    per-tile [sum, sum_sq] over valid columns
    """
    t = pl.program_id(1)

    x_lo = x_lo_ref[0]                                     # (C_in, T_tile)
    x_hi = x_hi_ref[0]                                     # (C_in, T_tile)
    x_win = jnp.concatenate([x_lo, x_hi], axis=-1)         # (C_in, 2*T_tile)

    # im2col along the contraction (sublane) axis -> (K*C_in, T_tile); taps are
    # static slices so the whole dilated conv is one MXU matmul (K = 7*C_in).
    cols = jnp.concatenate(
        [x_win[:, k * dilation:k * dilation + t_tile] for k in range(KSIZE)],
        axis=0)

    # Native-dtype operands (bf16 stays bf16), f32 accumulator.
    acc = jnp.dot(w_ref[...], cols, preferred_element_type=jnp.float32)
    conv_ref[0] = acc                                      # (C_out, T_tile) f32

    # Partial BN stats over the valid (unpadded) time columns of this tile.
    col_ids = jax.lax.broadcasted_iota(jnp.int32, (1, t_tile), 1)
    valid = col_ids < (t_valid - t * t_tile)               # (1, T_tile)
    masked = jnp.where(valid, acc, 0.0)
    s_sum = jnp.sum(masked, axis=-1, keepdims=True)                       # (C_out, 1)
    s_sq = jnp.sum(jnp.where(valid, acc * acc, 0.0), axis=-1, keepdims=True)
    stats_ref[0, 0] = jnp.concatenate([s_sum, s_sq], axis=-1)             # (C_out, 2)


def _bn_act_kernel(y_ref, scale_ref, shift_ref, out_ref, *, activate: str):
    """y*scale + shift (folded BatchNorm) then activation; lane-dense store."""
    z = y_ref[0] * scale_ref[...] + shift_ref[...]         # (C_out, T_tile) f32
    if activate == "sigmoid":
        z = jax.nn.sigmoid(z)
    else:
        z = jnp.tanh(z)
    out_ref[0] = z.astype(out_ref.dtype)


def aconv1d(x, weight, gamma, beta, *, dilation: int, activate: str = "sigmoid",
            t_tile: int | None = None):
    """PyTorch-equivalent forward. x: (N, C_in, T); weight: (C_out, C_in, 7)."""
    assert activate in ("sigmoid", "tanh")
    N, C_in, T = x.shape
    C_out, c_in_w, k_w = weight.shape
    assert c_in_w == C_in and k_w == KSIZE

    pad = 3 * dilation
    halo = 6 * dilation

    if t_tile is None:
        t_tile = 256                       # lane-aligned; bump for long sequences
    t_tile = _round_up(max(t_tile, halo), 128)

    nt = (T + t_tile - 1) // t_tile        # number of time tiles
    t_out = nt * t_tile                    # padded output length
    t_in = (nt + 1) * t_tile               # padded input length (extra block for halo)

    # NCT layout throughout: only a time-axis zero pad, no transposes.
    # TODO(synk): fold this pad into the kernel (edge masking) to drop one HBM copy.
    x_p = jnp.pad(x, ((0, 0), (0, 0), (pad, t_in - T - pad)))

    # Weights flattened to (C_out, K*C_in); row order matches the im2col (k major).
    w_flat = jnp.transpose(weight, (0, 2, 1)).reshape(C_out, KSIZE * C_in)
    w_flat = w_flat.astype(x.dtype)

    cp = pltpu.CompilerParams(dimension_semantics=("parallel", "parallel"))

    # ---- Kernel 1: dilated conv + per-tile BN partial stats -------------------
    conv_kernel = functools.partial(
        _conv_stats_kernel, dilation=dilation, t_tile=t_tile, t_valid=T)
    conv_out, partial_stats = pl.pallas_call(
        conv_kernel,
        grid=(N, nt),
        in_specs=[
            pl.BlockSpec((1, C_in, t_tile), lambda n, t: (n, 0, t)),
            pl.BlockSpec((1, C_in, t_tile), lambda n, t: (n, 0, t + 1)),  # halo block
            pl.BlockSpec((C_out, KSIZE * C_in), lambda n, t: (0, 0)),
        ],
        out_specs=(
            pl.BlockSpec((1, C_out, t_tile), lambda n, t: (n, 0, t)),
            pl.BlockSpec((1, 1, C_out, 2), lambda n, t: (n, t, 0, 0)),
        ),
        out_shape=(
            jax.ShapeDtypeStruct((N, C_out, t_out), jnp.float32),
            jax.ShapeDtypeStruct((N, nt, C_out, 2), jnp.float32),
        ),
        compiler_params=cp,
    )(x_p, x_p, w_flat)

    # ---- Global BatchNorm stats (single pass: E[x^2] - E[x]^2) -> scale/shift --
    sums = jnp.sum(partial_stats, axis=(0, 1))             # (C_out, 2)
    count = float(N * T)
    mean = sums[:, 0] / count
    var = jnp.maximum(sums[:, 1] / count - mean * mean, 0.0)   # biased var (training BN)
    rstd = jax.lax.rsqrt(var + EPS)
    g32 = gamma.astype(jnp.float32)
    scale = (g32 * rstd).reshape(C_out, 1)
    shift = (beta.astype(jnp.float32) - mean * g32 * rstd).reshape(C_out, 1)

    # ---- Kernel 2: folded BN FMA + activation ---------------------------------
    bn_kernel = functools.partial(_bn_act_kernel, activate=activate)
    out_pad = pl.pallas_call(
        bn_kernel,
        grid=(N, nt),
        in_specs=[
            pl.BlockSpec((1, C_out, t_tile), lambda n, t: (n, 0, t)),
            pl.BlockSpec((C_out, 1), lambda n, t: (0, 0)),
            pl.BlockSpec((C_out, 1), lambda n, t: (0, 0)),
        ],
        out_specs=pl.BlockSpec((1, C_out, t_tile), lambda n, t: (n, 0, t)),
        out_shape=jax.ShapeDtypeStruct((N, C_out, t_out), x.dtype),
        compiler_params=cp,
    )(conv_out, scale, shift)

    return out_pad[:, :, :T]


def _reference(x, weight, gamma, beta, *, dilation, activate):
    """Pure-JAX reference mirroring the PyTorch module."""
    pad = 3 * dilation
    x_p = jnp.pad(x, ((0, 0), (0, 0), (pad, pad)))
    out = jax.lax.conv_general_dilated(
        x_p, weight, window_strides=(1,), padding="VALID",
        rhs_dilation=(dilation,), dimension_numbers=("NCH", "OIH", "NCH"),
        precision=jax.lax.Precision.HIGHEST)
    mean = jnp.mean(out, axis=(0, 2), keepdims=True)
    var = jnp.mean((out - mean) ** 2, axis=(0, 2), keepdims=True)
    out = (out - mean) * jax.lax.rsqrt(var + EPS)
    out = out * gamma[None, :, None] + beta[None, :, None]
    return jax.nn.sigmoid(out) if activate == "sigmoid" else jnp.tanh(out)


if __name__ == "__main__":
    # Small shapes consistent with the module; T not a multiple of the tile to
    # exercise edge masking of the BatchNorm statistics.
    N, C_IN, C_OUT, T, DIL = 2, 8, 16, 400, 2

    key = jax.random.PRNGKey(0)
    kx, kw = jax.random.split(key)
    x = jax.random.normal(kx, (N, C_IN, T), dtype=jnp.float32)
    weight = jax.random.normal(kw, (C_OUT, C_IN, KSIZE), dtype=jnp.float32) * 0.1
    gamma = jnp.linspace(0.5, 1.5, C_OUT).astype(jnp.float32)
    beta = jnp.linspace(-0.2, 0.2, C_OUT).astype(jnp.float32)

    for act in ("sigmoid", "tanh"):
        out = aconv1d(x, weight, gamma, beta, dilation=DIL, activate=act, t_tile=256)
        out = jax.block_until_ready(out)
        ref = _reference(x, weight, gamma, beta, dilation=DIL, activate=act)
        assert out.shape == (N, C_OUT, T)
        assert jnp.allclose(out, ref, rtol=1e-4, atol=1e-4), f"mismatch vs reference ({act})"

    print("KERNEL_OK")
</pallas_src>

<mosaic_0001>
module attributes {stable_mosaic.version = 11 : i64} {
  func.func @_conv_stats_kernel(%arg0: i32, %arg1: i32, %arg2: memref<1x8x256xf32, #tpu.memory_space<vmem>>, %arg3: memref<1x8x256xf32, #tpu.memory_space<vmem>>, %arg4: memref<16x56xf32, #tpu.memory_space<vmem>>, %arg5: memref<1x16x256xf32, #tpu.memory_space<vmem>>, %arg6: memref<1x1x16x2xf32, #tpu.memory_space<vmem>>) attributes {dimension_semantics = [#tpu.dimension_semantics<parallel>, #tpu.dimension_semantics<parallel>], iteration_bounds = array<i64: 2, 2>, scalar_prefetch = 0 : i64, scratch_operands = 0 : i64, tpu.core_type = #tpu.core_type<tc>, window_params = [{transform_indices = @transform_0, window_bounds = array<i64: 1, 8, 256>}, {transform_indices = @transform_1, window_bounds = array<i64: 1, 8, 256>}, {pipeline_mode = #tpu.pipeline_mode<synchronous>, transform_indices = @transform_2, window_bounds = array<i64: 16, 56>}, {transform_indices = @transform_3, window_bounds = array<i64: 1, 16, 256>}, {transform_indices = @transform_4, window_bounds = array<i64: 1, 1, 16, 2>}]} {
    %c0 = arith.constant 0 : index
    %c0_0 = arith.constant 0 : index
    %c0_1 = arith.constant 0 : index
    %0 = vector.load %arg2[%c0, %c0_0, %c0_1] : memref<1x8x256xf32, #tpu.memory_space<vmem>>, vector<1x8x256xf32>
    %1 = vector.shape_cast %0 : vector<1x8x256xf32> to vector<8x256xf32>
    %c0_2 = arith.constant 0 : index
    %c0_3 = arith.constant 0 : index
    %c0_4 = arith.constant 0 : index
    %2 = vector.load %arg3[%c0_2, %c0_3, %c0_4] : memref<1x8x256xf32, #tpu.memory_space<vmem>>, vector<1x8x256xf32>
    %3 = vector.shape_cast %2 : vector<1x8x256xf32> to vector<8x256xf32>
    %4 = tpu.concatenate %1, %3 in 1 : vector<8x256xf32>, vector<8x256xf32> -> vector<8x512xf32>
    %5 = vector.extract_strided_slice %4 {offsets = [0, 0], sizes = [8, 256], strides = [1, 1]} : vector<8x512xf32> to vector<8x256xf32>
    %6 = vector.extract_strided_slice %4 {offsets = [0, 2], sizes = [8, 256], strides = [1, 1]} : vector<8x512xf32> to vector<8x256xf32>
    %7 = vector.extract_strided_slice %4 {offsets = [0, 4], sizes = [8, 256], strides = [1, 1]} : vector<8x512xf32> to vector<8x256xf32>
    %8 = vector.extract_strided_slice %4 {offsets = [0, 6], sizes = [8, 256], strides = [1, 1]} : vector<8x512xf32> to vector<8x256xf32>
    %9 = vector.extract_strided_slice %4 {offsets = [0, 8], sizes = [8, 256], strides = [1, 1]} : vector<8x512xf32> to vector<8x256xf32>
    %10 = vector.extract_strided_slice %4 {offsets = [0, 10], sizes = [8, 256], strides = [1, 1]} : vector<8x512xf32> to vector<8x256xf32>
    %11 = vector.extract_strided_slice %4 {offsets = [0, 12], sizes = [8, 256], strides = [1, 1]} : vector<8x512xf32> to vector<8x256xf32>
    %12 = tpu.concatenate %5, %6, %7, %8, %9, %10, %11 in 0 : vector<8x256xf32>, vector<8x256xf32>, vector<8x256xf32>, vector<8x256xf32>, vector<8x256xf32>, vector<8x256xf32>, vector<8x256xf32> -> vector<56x256xf32>
    %c0_5 = arith.constant 0 : index
    %c0_6 = arith.constant 0 : index
    %13 = vector.load %arg4[%c0_5, %c0_6] : memref<16x56xf32, #tpu.memory_space<vmem>>, vector<16x56xf32>
    %cst = arith.constant dense<0.000000e+00> : vector<16x256xf32>
    %14 = tpu.matmul %13, %12, %cst {dimension_numbers = #tpu.dot_dimension_numbers<[1], [0], [0], [1], [0, 0, 1, 1], [], []>} : vector<16x56xf32>, vector<56x256xf32>, vector<16x256xf32> -> vector<16x256xf32>
    %c0_7 = arith.constant 0 : index
    %c0_8 = arith.constant 0 : index
    %c0_9 = arith.constant 0 : index
    %15 = vector.load %arg5[%c0_7, %c0_8, %c0_9] : memref<1x16x256xf32, #tpu.memory_space<vmem>>, vector<1x16x256xf32>
    %16 = vector.shape_cast %15 : vector<1x16x256xf32> to vector<16x256xf32>
    %17 = vector.shape_cast %14 : vector<16x256xf32> to vector<1x16x256xf32>
    tpu.vector_store %arg5[%c0_7, %c0_8, %c0_9], %17 {strides = array<i32>} : memref<1x16x256xf32, #tpu.memory_space<vmem>>, vector<1x16x256xf32>,
    %18 = tpu.iota {dimensions = array<i32: 1>} : vector<1x256xi32>
    %c256_i32 = arith.constant 256 : i32
    %19 = arith.muli %arg1, %c256_i32 : i32
    %c400_i32 = arith.constant 400 : i32
    %20 = arith.subi %c400_i32, %19 : i32
    %21 = vector.broadcast %20 : i32 to vector<1x256xi32>
    %22 = arith.cmpi slt, %18, %21 : vector<1x256xi32>
    %cst_10 = arith.constant 0.000000e+00 : f32
    %23 = vector.shape_cast %22 : vector<1x256xi1> to vector<1x256xi1>
    %24 = vector.broadcast %23 : vector<1x256xi1> to vector<16x256xi1>
    %25 = vector.broadcast %cst_10 : f32 to vector<16x256xf32>
    %26 = arith.select %24, %14, %25 : vector<16x256xi1>, vector<16x256xf32>
    %cst_11 = arith.constant dense<0.000000e+00> : vector<16xf32>
    %27 = vector.multi_reduction <add>, %26, %cst_11 [1] : vector<16x256xf32> to vector<16xf32>
    %28 = vector.shape_cast %27 : vector<16xf32> to vector<16x1xf32>
    %29 = arith.mulf %14, %14 : vector<16x256xf32>
    %cst_12 = arith.constant 0.000000e+00 : f32
    %30 = vector.shape_cast %22 : vector<1x256xi1> to vector<1x256xi1>
    %31 = vector.broadcast %30 : vector<1x256xi1> to vector<16x256xi1>
    %32 = vector.broadcast %cst_12 : f32 to vector<16x256xf32>
    %33 = arith.select %31, %29, %32 : vector<16x256xi1>, vector<16x256xf32>
    %cst_13 = arith.constant dense<0.000000e+00> : vector<16xf32>
    %34 = vector.multi_reduction <add>, %33, %cst_13 [1] : vector<16x256xf32> to vector<16xf32>
    %35 = vector.shape_cast %34 : vector<16xf32> to vector<16x1xf32>
    %36 = tpu.concatenate %28, %35 in 1 : vector<16x1xf32>, vector<16x1xf32> -> vector<16x2xf32>
    %c0_14 = arith.constant 0 : index
    %c0_15 = arith.constant 0 : index
    %c0_16 = arith.constant 0 : index
    %c0_17 = arith.constant 0 : index
    %37 = vector.load %arg6[%c0_14, %c0_15, %c0_16, %c0_17] : memref<1x1x16x2xf32, #tpu.memory_space<vmem>>, vector<1x1x16x2xf32>
    %38 = vector.shape_cast %37 : vector<1x1x16x2xf32> to vector<16x2xf32>
    %39 = vector.shape_cast %36 : vector<16x2xf32> to vector<1x1x16x2xf32>
    tpu.vector_store %arg6[%c0_14, %c0_15, %c0_16, %c0_17], %39 {strides = array<i32>} : memref<1x1x16x2xf32, #tpu.memory_space<vmem>>, vector<1x1x16x2xf32>,
    return
  }
  func.func @transform_0(%arg0: i32, %arg1: i32) -> (i32, i32, i32) {
    %c0_i32 = arith.constant 0 : i32
    %c0_i32_0 = arith.constant 0 : i32
    return %arg0, %c0_i32, %arg1 : i32, i32, i32
  }
  func.func @transform_1(%arg0: i32, %arg1: i32) -> (i32, i32, i32) {
    %c1_i32 = arith.constant 1 : i32
    %0 = arith.addi %arg1, %c1_i32 : i32
    %c0_i32 = arith.constant 0 : i32
    %c0_i32_0 = arith.constant 0 : i32
    return %arg0, %c0_i32, %0 : i32, i32, i32
  }
  func.func @transform_2(%arg0: i32, %arg1: i32) -> (i32, i32) {
    %c0_i32 = arith.constant 0 : i32
    %c0_i32_0 = arith.constant 0 : i32
    %c0_i32_1 = arith.constant 0 : i32
    return %c0_i32, %c0_i32_0 : i32, i32
  }
  func.func @transform_3(%arg0: i32, %arg1: i32) -> (i32, i32, i32) {
    %c0_i32 = arith.constant 0 : i32
    %c0_i32_0 = arith.constant 0 : i32
    return %arg0, %c0_i32, %arg1 : i32, i32, i32
  }
  func.func @transform_4(%arg0: i32, %arg1: i32) -> (i32, i32, i32, i32) {
    %c0_i32 = arith.constant 0 : i32
    %c0_i32_0 = arith.constant 0 : i32
    %c0_i32_1 = arith.constant 0 : i32
    return %arg0, %arg1, %c0_i32, %c0_i32_0 : i32, i32, i32, i32
  }
}

</mosaic_0001>

<bundles_post_ra>
// kernel: tpu_custom_call.1
= control target key start
LH: loop header
LB: loop body
LE: loop exit
PB: predicated region body
PF: predicated region fallthrough
CT: control target
= control target key end

     0   :  { %s1480_s0 = inlined_call_operand.hbm [shape: f32[2,8,768], index: 0, kind: input, shape index: {}]   ;;  %s1481_s1 = inlined_call_operand.hbm [shape: f32[2,8,768], index: 1, kind: input, shape index: {}]   ;;  %s1482_s2 = inlined_call_operand.hbm [shape: f32[16,56], index: 2, kind: input, shape index: {}]   ;;  %s1483_s3 = inlined_call_operand.hbm [shape: f32[2,16,512], index: 3, kind: output, shape index: {0}]   ;;  %s1484_s4 = inlined_call_operand.vmem [shape: f32[2,2,16,2], index: 4, kind: output, shape index: {1}]  }
   0x1   :  { %1497 = sst [smem:[#allocation21_spill]] %s1482_s2 }
   0x2   :  { %1498 = sst [smem:[#allocation22_spill]] %s1483_s3 }
   0x3   :  { %1499 = sst [smem:[#allocation23_spill]] %s1484_s4 }
   0x4   :  { %10 = vsyncpa [#allocation3], 0 }
   0x5   :  { %12 = vsyncpa [#allocation3 + $0x1], 0 }
   0x6   :  { %13 = vsyncpa [#allocation6], 0 }
   0x7   :  { %15 = vsyncpa [#allocation6 + $0x1], 0 }
   0x8   :  { %16 = vsyncpa [#allocation4], 0 }
   0x9   :  { %18 = vsyncpa [#allocation4 + $0x1], 0  ;;  %s1144_s15 = smov 0   ;;  %s1146_s16 = smov 0  }
   0xa   :  { %s1148_s17 = smov 0   ;;  %s1150_s18 = smov 0  }
   0xb   :  { %s1152_s19 = smov 0   ;;  %s1154_s20 = smov 0  }
   0xc   :  { %s1156_s21 = smov 0   ;;  %s1158_s22 = smov 0  }
   0xd   :  { %s1160_s23 = smov 0   ;;  %s1162_s24 = smov 0  }
   0xe   :  { %s1164_s25 = smov 0  }
   0xf LB: > { %1500 = sst [smem:[#allocation13_spill]] %s1081_s20  ;;  %s1200_s26 = sadd.s32 4294967295, %s1101_s25   ;;  %s1101_s25 = sphi %s1164_s25, %s24_s25   ;;  %s1097_s24 = sphi %s1162_s24, %s1544_s24   ;;  %s1093_s23 = sphi %s1160_s23, %s1543_s23   ;;  %s1089_s22 = sphi %s1158_s22, %s1535_s22   ;;  %s1085_s21 = sphi %s1156_s21, %s1534_s21   ;;  %s1081_s20 = sphi %s1154_s20, %s1533_s20   ;;  %s1077_s19 = sphi %s1152_s19, %s1542_s19   ;;  %s1073_s18 = sphi %s1150_s18, %s1541_s18   ;;  %s1069_s17 = sphi %s1148_s17, %s1540_s17   ;;  %s1065_s16 = sphi %s1146_s16, %s1539_s16   ;;  %s1061_s15 = sphi %s1144_s15, %s1538_s15  }
  0x10   : > { %1501 = sst [smem:[#allocation14_spill]] %s1093_s23  ;;  %p719_p0 = scmp.ge.s32.totalorder %s1101_s25, 1 }
  0x11   : > { %1502 = sst [smem:[#allocation15_spill]] %s1097_s24  ;;  %p1495_p1 = scmp.eq.s32.totalorder %s1200_s26, 0 }
  0x12   : > { %p176_p2 = scmp.lt.s32.totalorder %s1101_s25, 5  ;;  %s1103_s28 = smov [#allocation7]  }
  0x13   : > { %s188_s29 = sshll.u32 %s1103_s28, 4  ;;  %s189_s29 = int_to_ptr.vmem [resolvable:$true] %s188_s29 }
  0x14   : > { %p1205_p3 = pnand %p719_p0, %p176_p2  ;;  %s901_s30 = scalar_lea.vmem %s189_s29, 256 }
  0x15   : > { %p902_p7 = scmp.ne.s32.totalorder %s189_s29, %s901_s30  ;;  %p909_p10 = scmp.lt.s32.totalorder %s189_s29, %s189_s29 }
  0x16   : > { %p770_p4 = pneg %p1205_p3  ;;  %p910_p11 = scmp.lt.s32.totalorder %s901_s30, %s901_s30 }
  0x18   : > { %p771_p5 = pnand %p770_p4, %p1495_p1  ;;  %p911_p12 = por %p910_p11, %p909_p10 }
  0x1a   : > { %p892_p6 = pneg %p771_p5 }
  0x1c   : > { %p904_p8 = pnand %p902_p7, %p892_p6 }
  0x1e   : > { %p905_p9 = pneg %p904_p8 }
  0x20   : > { %p912_p13 = pnand %p911_p12, %p905_p9 }
  0x22   : > { %915 = shalt.err (!%p912_p13)
}
  0x23   : > { %s1104_s5 = smov 128   ;;  %s1105_s6 = smov 8  }
  0x24   : > { %s1504_s2 = sld [smem:[#allocation21_spill]]  ;;  %s718_s9 = sadd.s32 4294967294, %s1101_s25  }
  0x25   : > { %s33_s10 = sadd.s32 1, %s1093_s23  ;;  %s36_s11 = sadd.s32 1, %s1097_s24 }
  0x26   : > { %p34_p0 = scmp.ge.s32.totalorder %s33_s10, 2  ;;  %s45_s12 = sadd.s32 1, %s1081_s20 }
  0x27   : > { %p52_p2 = scmp.ne.s32.totalorder %s1081_s20, %s1077_s19  ;;  %p1496_p4 = scmp.eq.s32.totalorder %s1101_s25, 0 }
  0x28   : > { %s1223_s13 = scalar_select %p34_p0, 0, %s33_s10  }
  0x29   : > { %s1546_s11 = smov (!%p34_p0, %s36_s11), %s1097_s24  ;;  %p58_p7 = scmp.ne.s32.totalorder %s1077_s19, %s1073_s18 }
  0x2a   : > { %773 = dma.hbm_to_vmem [thread:$0]  (!%p771_p5), %s1504_s2, 256, %s189_s29, [#allocation6], %s1104_s5, %s1104_s5, %s1105_s6  }
  0x2b   : > { %1505 = sst [smem:[#allocation16_spill]] %s1223_s13  ;;  %s41_s14 = ssub.s32 %s1093_s23, %s1223_s13 }
  0x2c   : > { %p1233_p5 = por %p1496_p4, %p52_p2  ;;  %p38_p6 = scmp.ge.s32.totalorder %s1546_s11, 2 }
  0x2d   : > { %s69_s29 = sadd.s32 1, %s1223_s13  ;;  %p135_p8 = scmp.eq.s32.totalorder %s1200_s26, 3 }
  0x2e   : > { %s1548_s11 = smov (%p38_p6, %s1546_s11), 0  ;;  %p1248_p9 = por %p1495_p1, %p58_p7 }
  0x2f   : > { %1507 = sst [smem:[#allocation17_spill]] %s1548_s11  ;;  %s71_s5 = ssub.s32 %s33_s10, %s69_s29 }
  0x30   : > { %s40_s6 = ssub.s32 %s1097_s24, %s1548_s11  ;;  %p1257_p10 = por %p135_p8, %p52_p2 }
  0x31   : > { %s42_s8 = sor.u32 %s41_s14, %s40_s6  ;;  %s72_s2 = sor.u32 %s71_s5, %s40_s6 }
  0x32   : > { %s1509_s7 = scalar_select %p1257_p10, 1, 0 }
  0x33   : > { %p43_p11 = scmp.eq.s32.totalorder %s42_s8, 0  ;;  %p1261_p12 = scmp.eq.s32.totalorder %s72_s2, 0 }
  0x34   : > { %1510 = sst [smem:[#allocation18_spill]] %s1509_s7  ;;  %p141_p13 = scmp.eq.s32.totalorder %s718_s9, 3 }
  0x35   : > { %p1494_p0 = scmp.lt.s32.totalorder %s1101_s25, 4  ;;  %s202_s29 = sand.u32 1, %s1081_s20  }
  0x36   : > { %s1267_s4 = scalar_select %p43_p11, %s1081_s20, %s45_s12  }
  0x37   : > { %p1272_p6 = por %p141_p13, %p58_p7  ;;  %s722_s11 = sshll.u32 %s202_s29, 4 }
  0x38   : > { %1512 = sst [smem:[#allocation19_spill]] %s1267_s4  ;;  %s723_s3 = sshll.u32 %s1093_s23, 1 }
  0x39   : > { %s1513_s10 = scalar_select %p1272_p6, 1, 0 }
  0x3a   : > { %s759_s7 = smul.u32 6, %s1097_s24  ;;  %s206_s14 = scalar_lea.vmem [#allocation2], %s722_s11 }
  0x3b   : > { %1514 = sst [smem:[#allocation20_spill]] %s1513_s10  ;;  %s216_s5 = sshll.u32 %s206_s14, 4  ;;  %s217_s5 = int_to_ptr.vmem [resolvable:$true] %s216_s5 }
  0x3c   : > { %p1283_p2 = pnand %p1494_p0, %p1233_p5  ;;  %s212_s9 = sadd.s32 %s759_s7, %s723_s3 }
  0x3d   : > { %s724_s12 = sshll.u32 %s212_s9, 7  ;;  %s203_s11 = scalar_lea.sflag [#allocation3], %s202_s29 }
  0x3e   : > { %s214_s4 = scalar_lea.hbm %s1480_s0, %s724_s12  ;;  %s1293_s24 = scalar_lea.hbm %s1481_s1, %s724_s12 }
  0x3f   : > { %p918_p7 = pneg %p1283_p2  ;;  %s929_s28 = scalar_lea.vmem %s217_s5, 256 }
  0x40   : > { %p930_p5 = scmp.ne.s32.totalorder %s217_s5, %s929_s28  ;;  %s1106_s14 = smov [#allocation2]  }
  0x41   : > { %s934_s23 = sshll.u32 %s1106_s14, 4  ;;  %s935_s23 = int_to_ptr.vmem [resolvable:$false] %s934_s23 }
  0x42   : > { %p932_p8 = pnand %p930_p5, %p918_p7  ;;  %s936_s3 = scalar_lea.vmem %s935_s23, 512 }
  0x43   : > { %p937_p13 = scmp.lt.s32.totalorder %s217_s5, %s935_s23  ;;  %p938_p0 = scmp.lt.s32.totalorder %s936_s3, %s929_s28 }
  0x44   : > { %p933_p11 = pneg %p932_p8 }
  0x45   : > { %p939_p1 = por %p938_p0, %p937_p13 }
  0x47   : > { %p940_p4 = pnand %p939_p1, %p933_p11 }
  0x49   : > { %943 = shalt.err (!%p940_p4)
}
  0x4a   : > { %777 = dma.hbm_to_vmem [thread:$0]  (!%p1283_p2), %s214_s4, 256, %s217_s5, %s203_s11  }
  0x4b   : > { %s75_s20 = sadd.s32 1, %s1069_s17  ;;  %p82_p1 = scmp.ne.s32.totalorder %s1069_s17, %s1065_s16 }
  0x4c   : > { %s1303_s23 = scalar_select %p1261_p12, %s1069_s17, %s75_s20  }
  0x4d   : > { %p88_p4 = scmp.ne.s32.totalorder %s1065_s16, %s1061_s15  ;;  %s223_s7 = sand.u32 1, %s1101_s25  }
  0x4e   : > { %s225_s10 = sand.u32 1, %s1069_s17   ;;  %p1516_p0 = scmp.eq.s32.totalorder %s1101_s25, 0 }
  0x4f   : > { %p1517_p5 = scmp.eq.s32.totalorder %s1200_s26, 0  ;;  %s725_s2 = sshll.u32 %s225_s10, 4 }
  0x50   : > { %p84_p7 = por %p82_p1, %p1516_p0  ;;  %s608_s9 = scalar_lea.hbm %s1293_s24, 256 }
  0x51   : > { %p1315_p8 = por %p88_p4, %p1517_p5  ;;  %s227_s12 = scalar_lea.vmem [#allocation5], %s725_s2 }
  0x52   : > { %s238_s6 = sshll.u32 %s227_s12, 4  ;;  %p1519_p2 = scmp.lt.s32.totalorder %s1101_s25, 4  ;;  %s239_s6 = int_to_ptr.vmem [resolvable:$true] %s238_s6 }
  0x53   : > { %s224_s15 = scalar_lea.sflag [#allocation6], %s223_s7  ;;  %s957_s13 = scalar_lea.vmem %s239_s6, 256 }
  0x54   : > { %p1322_p11 = pnand %p1519_p2, %p84_p7  ;;  %p958_p13 = scmp.ne.s32.totalorder %s239_s6, %s957_s13 }
  0x55   : > { %s1107_s5 = smov [#allocation5]  }
  0x56   : > { %p946_p12 = pneg %p1322_p11  ;;  %s962_s8 = sshll.u32 %s1107_s5, 4  ;;  %s963_s8 = int_to_ptr.vmem [resolvable:$false] %s962_s8 }
  0x57   : > { %s964_s24 = scalar_lea.vmem %s963_s8, 512  ;;  %p965_p0 = scmp.lt.s32.totalorder %s239_s6, %s963_s8 }
  0x58   : > { %p960_p1 = pnand %p958_p13, %p946_p12  ;;  %p966_p5 = scmp.lt.s32.totalorder %s964_s24, %s957_s13 }
  0x5a   : > { %p961_p4 = pneg %p960_p1  ;;  %p967_p6 = por %p966_p5, %p965_p0 }
  0x5c   : > { %p968_p7 = pnand %p967_p6, %p961_p4 }
  0x5e   : > { %971 = shalt.err (!%p968_p7)
}
  0x5f   : > { %780 = dma.hbm_to_vmem [thread:$0]  (!%p1322_p11), %s608_s9, 256, %s239_s6, %s224_s15  }
  0x60   : > { %247 = sbr.rel (%p1205_p3) target bundleno = 608 (0x260), region = 32  ;;  %s1333_s11 = sand.u32 (!%p1205_p3), 1, %s1077_s19  }
  0x61   : > { %s729_s28 = sshll.u32 (!%p1205_p3), %s1333_s11, 4  ;;  %s250_s14 = scalar_lea.sflag (!%p1205_p3), [#allocation3], %s1333_s11 }
  0x62   : > { %s253_s3 = scalar_lea.vmem (!%p1205_p3), [#allocation2], %s729_s28 }
  0x65   : > { %1044 = dma.done.wait (%p1248_p9), %s250_s14, 256  }
  0x66   : > { %1046 = vsyncadd (%p1248_p9), %s250_s14, 4294967040  ;;  %s258_s20 = sand.u32 1, %s1200_s26   ;;  %s260_s27 = sand.u32 1, %s1065_s16  }
  0x67   : > { %s730_s7 = sshll.u32 %s260_s27, 4  ;;  %s259_s10 = scalar_lea.sflag [#allocation6], %s258_s20 }
  0x68   : > { %s262_s2 = scalar_lea.vmem [#allocation5], %s730_s7 }
  0x69   : > { %1048 = dma.done.wait (%p1315_p8), %s259_s10, 256  }
  0x6a   : > { %1050 = vsyncadd (%p1315_p8), %s259_s10, 4294967040  ;;  %p1521_p3 = scmp.eq.s32.totalorder %s1200_s26, 0 }
  0x6c   : > { %1052 = dma.done.wait (%p1521_p3), [#allocation6], 256   ;;  %p1522_p6 = pmov %p1521_p3 }
  0x6d   : > { %v1351_v0 = vld [vmem:[%s253_s3 + $0x8] sm:$0xff]  ;;  %v1353_v1 = vld [vmem:[%s253_s3] sm:$0xff]  ;;  %s1108_s30 = smov 116   ;;  %s1109_s9 = smov 118   ;;  %v1112_v3 = vmov 0.0   ;;  %vm385_vm0 = vcmask 949248   ;;  %v480_v36 = vlaneseq }
  0x6e   : > { %1054 = vsyncadd (%p1522_p6), [#allocation6], 4294967040  ;;  %381 = vrot.lane.b32.xlu0 %v1351_v0, %s1108_s30  ;;  %379 = vrot.lane.b32.xlu1 %v1353_v1, %s1108_s30  ;;  %v320_v2 = vld [vmem:[%s262_s2] sm:$0xff]  ;;  %s1110_s29 = smov 120   ;;  %s1111_s26 = smov 122   ;;  %vm374_vm1 = vcmask 965632  }
  0x6f   : > { %463 = vmatprep.mubr.f32.mxu0 %v1112_v3  ;;  %469 = vmatprep.mubr.f32.mxu1 %v1112_v3  ;;  %s1113_s12 = smov 124   ;;  %s1114_s6 = smov 126   ;;  %vm363_vm2 = vcmask 982016   ;;  %vm352_vm3 = vcmask 998400   ;;  %vm341_vm4 = vcmask 1014784   ;;  %vm330_vm5 = vcmask 1031168  }
  0x70   : > { %v390_v34 = vld [vmem:[#allocation7] sm:$0xff]  ;;  %vm392_vm6 = vcmask 457728   ;;  %v391_v35 = vld [vmem:[#allocation7 + $0x8] sm:$0xff]  ;;  %s738_s4 = sshll.u32 %s1085_s21, 8  ;;  %v481_v37 = vand.u32 127, %v480_v36  ;;  %s732_s13 = sshll.u32 %s1333_s11, 5 }
  0x71   : > { %s484_s15 = ssub.s32 400, %s738_s4  ;;  %s1381_s5 = scalar_lea.vmem [#allocation8], %s732_s13 }
  0x72   : > { %383 = vrot.lane.b32.xlu0 %v320_v2, %s1108_s30  ;;  %370 = vrot.lane.b32.xlu1 %v1351_v0, %s1109_s9  ;;  %v482_v38 = vadd.s32 128, %v481_v37  ;;  %v485_v39 = vstv %s484_s15  ;;  %s547_s24 = sshll.u32 %s1381_s5, 4  ;;  %s740_s28 = sshll.u32 %s1085_s21, 1  ;;  %s1406_s24 = int_to_ptr.vmem [resolvable:$true] %s547_s24 }
  0x73   : > { %vm1377_vm8 = vcmp.lt.s32.totalorder %v481_v37, %v485_v39  ;;  %s741_s14 = sshll.u32 %s1089_s22, 3  ;;  %s1528_s10 = sld [smem:[#allocation22_spill]] }
  0x74   : > { %vm1373_vm7 = vcmp.lt.s32.totalorder %v482_v38, %v485_v39  ;;  %s544_s3 = sadd.s32 %s741_s14, %s740_s28  ;;  %s523_s30 = scalar_lea.sflag [#allocation4], %s1333_s11 }
  0x75   : > { %s742_s20 = sshll.u32 %s544_s3, 7 }
  0x76   : > { %372 = vrot.lane.b32.xlu0 %v320_v2, %s1109_s9  ;;  %368 = vrot.lane.b32.xlu1 %v1353_v1, %s1109_s9  ;;  %s973_s9 = scalar_lea.vmem %s1406_s24, 512 }
  0x77   : > { %p974_p9 = scmp.ne.s32.totalorder %s1406_s24, %s973_s9 }
  0x79   : > { %s1411_s2 = scalar_lea.hbm %s1528_s10, %s742_s20  ;;  %p975_p8 = pnand %p974_p9, %p1257_p10 }
  0x7a   : > { %359 = vrot.lane.b32.xlu0 %v1351_v0, %s1110_s29  ;;  %361 = vrot.lane.b32.xlu1 %v320_v2, %s1110_s29 }
  0x7b   : > { %p976_p2 = pneg %p975_p8 }
  0x7e   : > { %357 = vrot.lane.b32.xlu0 %v1353_v1, %s1110_s29  ;;  %348 = vrot.lane.b32.xlu1 %v1351_v0, %s1111_s26  ;;  %s1115_s29 = smov [#allocation8]  }
  0x82   : > { %350 = vrot.lane.b32.xlu0 %v320_v2, %s1111_s26  ;;  %346 = vrot.lane.b32.xlu1 %v1353_v1, %s1111_s26  ;;  %s977_s26 = sshll.u32 %s1115_s29, 4  ;;  %s978_s26 = int_to_ptr.vmem [resolvable:$false] %s977_s26 }
  0x83   : > { %p980_p11 = scmp.lt.s32.totalorder %s1406_s24, %s978_s26 }
  0x86   : > { %337 = vrot.lane.b32.xlu0 %v1351_v0, %s1113_s12  ;;  %339 = vrot.lane.b32.xlu1 %v320_v2, %s1113_s12 }
  0x8a   : > { %335 = vrot.lane.b32.xlu0 %v1353_v1, %s1113_s12  ;;  %326 = vrot.lane.b32.xlu1 %v1351_v0, %s1114_s6  ;;  %s979_s12 = scalar_lea.vmem %s978_s26, 1024 }
  0x8b   : > { %p981_p12 = scmp.lt.s32.totalorder %s979_s12, %s973_s9 }
  0x8d   : > { %p982_p13 = por %p981_p12, %p980_p11 }
  0x8e   : > { %328 = vrot.lane.b32.xlu0 %v320_v2, %s1114_s6  ;;  %324 = vrot.lane.b32.xlu1 %v1353_v1, %s1114_s6 }
  0x8f   : > { %p983_p1 = pnand %p982_p13, %p976_p2 }
  0xe0   : > { %v382_v4 = vpop.permute.xlu0 %381  ;;  %v380_v5 = vpop.permute.xlu1 %379 }
  0xe1   : > { %v386_v9 = vsel %vm385_vm0, %v380_v5, %v382_v4 }
  0xe4   : > { %v384_v6 = vpop.permute.xlu0 %383  ;;  %v371_v7 = vpop.permute.xlu1 %370 }
  0xe5   : > { %v387_v8 = vsel %vm385_vm0, %v382_v4, %v384_v6 }
  0xe6   : > { %417 = vmatprep.subr.mxu0 %v387_v8  ;;  %745 = vmatprep.subr.mxu1 %v387_v8 }
  0xe7   : > { %418 = vmatpush1.msra.mxu0 %v386_v9  ;;  %752 = vmatpush1.msra.mxu1 %v386_v9 }
  0xe8   : > { %v373_v10 = vpop.permute.xlu0 %372  ;;  %v369_v11 = vpop.permute.xlu1 %368 }
  0xe9   : > { %v376_v12 = vsel %vm374_vm1, %v371_v7, %v373_v10  ;;  %v375_v13 = vsel %vm374_vm1, %v369_v11, %v371_v7 }
  0xea   : > { %419 = vmatprep.subr.mxu0 %v376_v12  ;;  %746 = vmatprep.subr.mxu1 %v376_v12 }
  0xeb   : > { %420 = vmatpush1.msra.mxu0 %v375_v13  ;;  %753 = vmatpush1.msra.mxu1 %v375_v13 }
  0xec   : > { %v360_v14 = vpop.permute.xlu0 %359  ;;  %v362_v15 = vpop.permute.xlu1 %361 }
  0xed   : > { %v365_v16 = vsel %vm363_vm2, %v360_v14, %v362_v15 }
  0xee   : > { %421 = vmatprep.subr.mxu0 %v365_v16  ;;  %747 = vmatprep.subr.mxu1 %v365_v16 }
  0xf0   : > { %v358_v17 = vpop.permute.xlu0 %357  ;;  %v349_v18 = vpop.permute.xlu1 %348 }
  0xf1   : > { %v364_v19 = vsel %vm363_vm2, %v358_v17, %v360_v14 }
  0xf2   : > { %422 = vmatpush1.msra.mxu0 %v364_v19  ;;  %754 = vmatpush1.msra.mxu1 %v364_v19 }
  0xf4   : > { %v351_v20 = vpop.permute.xlu0 %350  ;;  %v347_v21 = vpop.permute.xlu1 %346 }
  0xf5   : > { %v354_v22 = vsel %vm352_vm3, %v349_v18, %v351_v20  ;;  %v353_v23 = vsel %vm352_vm3, %v347_v21, %v349_v18 }
  0xf6   : > { %423 = vmatprep.subr.mxu0 %v354_v22  ;;  %748 = vmatprep.subr.mxu1 %v354_v22 }
  0xf7   : > { %424 = vmatpush1.msra.mxu0 %v353_v23  ;;  %755 = vmatpush1.msra.mxu1 %v353_v23 }
  0xf8   : > { %v338_v24 = vpop.permute.xlu0 %337  ;;  %v340_v25 = vpop.permute.xlu1 %339 }
  0xf9   : > { %v343_v26 = vsel %vm341_vm4, %v338_v24, %v340_v25 }
  0xfa   : > { %425 = vmatprep.subr.mxu0 %v343_v26  ;;  %749 = vmatprep.subr.mxu1 %v343_v26 }
  0xfc   : > { %v336_v27 = vpop.permute.xlu0 %335  ;;  %v327_v28 = vpop.permute.xlu1 %326 }
  0xfd   : > { %v342_v29 = vsel %vm341_vm4, %v336_v27, %v338_v24 }
  0xfe   : > { %426 = vmatpush1.msra.mxu0 %v342_v29  ;;  %756 = vmatpush1.msra.mxu1 %v342_v29 }
 0x100   : > { %v329_v30 = vpop.permute.xlu0 %328  ;;  %v325_v31 = vpop.permute.xlu1 %324 }
 0x101   : > { %v332_v32 = vsel %vm330_vm5, %v327_v28, %v329_v30  ;;  %v331_v33 = vsel %vm330_vm5, %v325_v31, %v327_v28 }
 0x102   : > { %427 = vmatprep.subr.mxu0 %v332_v32  ;;  %750 = vmatprep.subr.mxu1 %v332_v32 }
 0x103   : > { %428 = vmatpush1.msra.mxu0 %v331_v33  ;;  %757 = vmatpush1.msra.mxu1 %v331_v33 }
 0x104   : > { %429 = vmatprep.subr.mxu0 %v1351_v0  ;;  %751 = vmatprep.subr.mxu1 %v1351_v0 }
 0x105   : > { %430 = vmatpush1.msra.mxu0 %v1353_v1  ;;  %758 = vmatpush1.msra.mxu1 %v1353_v1 }
 0x106   : > { %736 = vmatmul.mubr.msk.f32.vlgmr.msra.gmra.mxu0 %vm392_vm6, %v390_v34  ;;  %737 = vmatmul.mubr.msk.f32.vlgmr.msra.gmra.mxu1 %vm392_vm6, %v391_v35 }
 0x1c6   : > { %v465_v40 = vpop.f32.mrf.mxu0  ;;  %v471_v42 = vpop.f32.mrf.mxu1 }
 0x1c7   : > { %476 = vst [vmem:[%s1381_s5] sm:$0xff] %v465_v40  ;;  %478 = vst [vmem:[%s1381_s5 + $0x10] sm:$0xff] %v471_v42  ;;  %v494_v44 = vsel %vm1377_vm8, %v471_v42, 0.0  ;;  %v502_v45 = vmul.f32 %v465_v40, %v465_v40  ;;  %v492_v51 = vsel %vm1377_vm8, %v465_v40, 0.0  ;;  %v504_v54 = vmul.f32 %v471_v42, %v471_v42 }
 0x1c8   : > { %v467_v46 = vpop.f32.mrf.mxu0  ;;  %v473_v47 = vpop.f32.mrf.mxu1 }
 0x1c9   : > { %477 = vst [vmem:[%s1381_s5 + $0x8] sm:$0xff] %v467_v46  ;;  %v493_v48 = vsel %vm1373_vm7, %v467_v46, 0.0  ;;  %v503_v49 = vmul.f32 %v467_v46, %v467_v46  ;;  %479 = vst [vmem:[%s1381_s5 + $0x18] sm:$0xff] %v473_v47  ;;  %v495_v50 = vsel %vm1373_vm7, %v473_v47, 0.0  ;;  %v505_v55 = vmul.f32 %v473_v47, %v473_v47 }
 0x1ca   : > { %v496_v52 = vadd.f32 %v493_v48, %v492_v51  ;;  %v499_v53 = vadd.f32 %v495_v50, %v494_v44  ;;  %v506_v57 = vsel %vm1377_vm8, %v502_v45, 0.0  ;;  %v508_v59 = vsel %vm1377_vm8, %v504_v54, 0.0 }
 0x1cb   : > { %v507_v56 = vsel %vm1373_vm7, %v503_v49, 0.0  ;;  %v509_v60 = vsel %vm1373_vm7, %v505_v55, 0.0 }
 0x1cc   : > { %497 = vadd.xlane.f32.xlu0 %v496_v52  ;;  %500 = vadd.xlane.f32.xlu1 %v499_v53  ;;  %v510_v58 = vadd.f32 %v507_v56, %v506_v57  ;;  %v513_v61 = vadd.f32 %v509_v60, %v508_v59 }
 0x1d0   : > { %511 = vadd.xlane.f32.xlu0 %v510_v58 }
 0x1d4   : > { %514 = vadd.xlane.f32.xlu0 %v513_v61 }
 0x1d5   : > { %986 = shalt.err (!%p983_p1)
}
 0x1d6   : > { %s987_s6 = scalar_lea.hbm %s1411_s2, 512  ;;  %s991_s13 = scalar_lea.hbm %s1528_s10, 2048 }
 0x1d7   : > { %p988_p4 = scmp.ne.s32.totalorder %s1411_s2, %s987_s6  ;;  %p992_p7 = scmp.lt.s32.totalorder %s1411_s2, %s1528_s10 }
 0x1d8   : > { %p993_p3 = scmp.lt.s32.totalorder %s991_s13, %s987_s6 }
 0x1d9   : > { %p989_p0 = pnand %p988_p4, %p1257_p10 }
 0x1da   : > { %p994_p6 = por %p993_p3, %p992_p7 }
 0x1db   : > { %p990_p5 = pneg %p989_p0 }
 0x1dd   : > { %p995_p9 = pnand %p994_p6, %p990_p5 }
 0x1df   : > { %998 = shalt.err (!%p995_p9)
}
 0x1e0   : > { %s1116_s14 = smov 256   ;;  %s1117_s3 = smov 512   ;;  %vm516_vm9 = vcmask 7168   ;;  %vm519_vm10 = vcmask 15360  }
 0x1e1   : > { %s1118_s20 = smov 16   ;;  %p309_p8 = scmp.lt.s32.totalorder %s1089_s22, 1 }
 0x1e2   : > { %768 = dma.vmem_to_hbm [thread:$0]  (%p1257_p10), %s1406_s24, 512, %s1411_s2, %s523_s30, %s1116_s14, %s1117_s3, %s1118_s20  }
 0x1e3   : > { %p311_p2 = scmp.lt.s32.totalorder %s1085_s21, 1  ;;  %s1550_s22 = smov (!%p309_p8, %s1089_s22), 1 }
 0x1e4   : > { %s734_s7 = sshll.u32 %s1550_s22, 2  ;;  %s1529_s6 = sld [smem:[#allocation23_spill]] }
 0x1e5   : > { %s1552_s21 = smov (!%p311_p2, %s1085_s21), 1 }
 0x1e6   : > { %s733_s27 = sshll.u32 %s1552_s21, 1 }
 0x1e7   : > { %s315_s9 = sadd.s32 %s734_s7, %s733_s27 }
 0x1e8   : > { %s735_s29 = sshll.u32 %s315_s9, 3 }
 0x1ea   : > { %s317_s4 = scalar_lea.vmem %s1529_s6, %s735_s29 }
 0x255   : > { %v498_v62 = vpop.xlane.xlu0 %497  ;;  %v501_v1 = vpop.xlane.xlu1 %500 }
 0x259   : > { %v512_v63 = vpop.xlane.xlu0 %511 }
 0x25a   : > { %v517_v0 = vsel %vm516_vm9, %v498_v62, %v512_v63 }
 0x25b   : > { %520 = vst.msk [vmem:[%s317_s4] sm:$0xff] %vm519_vm10, %v517_v0 }
 0x25d   : > { %v515_v2 = vpop.xlane.xlu0 %514 }
 0x25e   : > { %v518_v3 = vsel %vm516_vm9, %v501_v1, %v515_v2 }
 0x25f   : > { %521 = vst.msk [vmem:[%s317_s4 + $0x8] sm:$0xff] %vm519_vm10, %v518_v3 }
 0x260 PF: > { %s1530_s21 = sld [smem:[#allocation20_spill]]  ;;  %p788_p10 = scmp.ge.s32.totalorder %s1101_s25, 2 }
 0x261   : > { %s565_s22 = sand.u32 1, %s1073_s18  }
 0x262   : > { %s566_s11 = scalar_lea.sflag [#allocation4], %s565_s22 }
 0x266   : > { %p1531_p11 = scmp.ne.s32.totalorder %s1530_s21, 0 }
 0x268   : > { %p782_p12 = pnand %p788_p10, %p1531_p11 }
 0x26a   : > { %p783_p13 = pneg %p782_p12 }
 0x26c   : > { %1056 = dma.done.wait (%p783_p13), %s566_s11, 512  }
 0x26d   : > { %1058 = vsyncadd (%p783_p13), %s566_s11, 4294966784  ;;  %s24_s25 = sadd.s32 1, %s1101_s25   ;;  %s1532_s8 = sld [smem:[#allocation13_spill]] }
 0x26e   : > { %p21_p1 = scmp.ge.s32.totalorder %s24_s25, 6   ;;  %s1533_s20 = sld [smem:[#allocation19_spill]] }
 0x26f   : > { %s1534_s21 = sld [smem:[#allocation14_spill]]  ;;  %s1538_s15 = smov %s1065_s16 }
 0x270   : > { %s1535_s22 = sld [smem:[#allocation15_spill]]  ;;  %s1539_s16 = smov %s1069_s17 }
 0x271   : > { %s1536_s24 = sld [smem:[#allocation16_spill]]  ;;  %s1540_s17 = smov %s1303_s23 }
 0x272   : > { %s1537_s2 = sld [smem:[#allocation17_spill]]  ;;  %s1541_s18 = smov %s1077_s19 }
 0x273   : > { %s1542_s19 = smov %s1532_s8 }
 0x274   :  { %23 = sbr.rel (!%p21_p1) target bundleno = 15 (0xf), region = 106 }
 0x277   : > { %s1543_s23 = smov %s1536_s24 }
 0x278   : > { %s1544_s24 = smov %s1537_s2 }
 0x279   :  { %583 = vsyncpa [#allocation3], 1 }
 0x27a   :  { %585 = vsyncpa [#allocation3 + $0x1], 1 }
 0x27b   :  { %586 = vsyncpa [#allocation6], 1 }
 0x27c   :  { %588 = vsyncpa [#allocation6 + $0x1], 1 }
 0x27d   :  { %589 = vsyncpa [#allocation4], 1 }
 0x27e   :  { %591 = vsyncpa [#allocation4 + $0x1], 1 }

</bundles_post_ra>
